<compile_context>
chip_gen: v7x
topology: tpu7x:2x2x1
jax: 0.10.0
libtpu: 0.0.40
codegen_flags: <defaults>
</compile_context>

<pallas_src>
import functools
import math

import numpy as np
import jax
import jax.numpy as jnp
from jax.experimental import pallas as pl
from jax.experimental.pallas import tpu as pltpu

_VMEM_LIMIT = 48 * 1024 * 1024      # explicit scoped-VMEM cap (fits v5e/v6e/v7x)


def _detect_bf16_vpu():
    """bf16 VALU exists on v6e/v7x; keep prologue math in f32 on v2-v5."""
    try:
        kind = jax.devices()[0].device_kind.lower()
    except Exception:
        return True
    for tag in ("v2", "v3", "v4", "v5"):
        if tag in kind:
            return False
    return True


_BF16_VPU = _detect_bf16_vpu()


# ----------------------------------------------------------------------------
# small helpers (glue)
# ----------------------------------------------------------------------------
def _round_up(n, m):
    return n + (-n) % m


def _pick_div(n, cap, align):
    """Largest divisor of n that is <= cap and a multiple of `align`."""
    best = align
    d = align
    top = min(n, cap)
    while d <= top:
        if n % d == 0:
            best = d
        d += align
    return best


def _pad2d(x, m0, m1):
    p0 = (-x.shape[0]) % m0
    p1 = (-x.shape[1]) % m1
    if p0 or p1:
        x = jnp.pad(x, ((0, p0), (0, p1)))
    return x


def _full_spec(shape):
    return pl.BlockSpec(shape, lambda i, _s=len(shape): (0,) * _s)


def _cparams(sem):
    return pltpu.CompilerParams(dimension_semantics=sem,
                                vmem_limit_bytes=_VMEM_LIMIT)


# ----------------------------------------------------------------------------
# fused tiled matmul:  out = [BN(+ReLU)] ( [BN+ReLU](A) @ B )
# ----------------------------------------------------------------------------
def _prologue(a, pro_ref, pro_bf16, tgt_dtype):
    """Folded BatchNorm + ReLU on the input channels (per K column)."""
    if pro_bf16:
        return jnp.maximum(a * pro_ref[0:1, :] + pro_ref[1:2, :], 0.0)
    a = jnp.maximum(a.astype(jnp.float32) * pro_ref[0:1, :] + pro_ref[1:2, :], 0.0)
    return a.astype(tgt_dtype)


def _epilogue(r, epi_ref, epi_relu):
    """Folded BatchNorm (+ReLU) on the output channels (per N column), f32."""
    if epi_ref is not None:
        r = r * epi_ref[0:1, :] + epi_ref[1:2, :]
    if epi_relu:
        r = jnp.maximum(r, 0.0)
    return r


def _make_mm1_kernel(has_pro, pro_bf16, has_epi, epi_relu):
    """Single-K-step fused matmul: no accumulator scratch, direct store."""
    def kernel(*refs):
        a_ref, b_ref = refs[0], refs[1]
        idx = 2
        pro_ref = epi_ref = None
        if has_pro:
            pro_ref = refs[idx]; idx += 1
        if has_epi:
            epi_ref = refs[idx]; idx += 1
        o_ref = refs[idx]

        a = a_ref[...]
        if has_pro:
            a = _prologue(a, pro_ref, pro_bf16, b_ref.dtype)
        r = jnp.dot(a, b_ref[...], preferred_element_type=jnp.float32)
        r = _epilogue(r, epi_ref, epi_relu)
        o_ref[...] = r.astype(o_ref.dtype)

    return kernel


def _make_mmk_kernel(has_pro, pro_bf16, has_epi, epi_relu):
    """Multi-K-step fused matmul with f32 VMEM accumulator (generic fallback)."""
    def kernel(*refs):
        a_ref, b_ref = refs[0], refs[1]
        idx = 2
        pro_ref = epi_ref = None
        if has_pro:
            pro_ref = refs[idx]; idx += 1
        if has_epi:
            epi_ref = refs[idx]; idx += 1
        o_ref, acc_ref = refs[idx], refs[idx + 1]
        kk = pl.program_id(2)

        a = a_ref[...]
        if has_pro:
            a = _prologue(a, pro_ref, pro_bf16, b_ref.dtype)
        contrib = jnp.dot(a, b_ref[...], preferred_element_type=jnp.float32)

        @pl.when(kk == 0)
        def _first():
            acc_ref[...] = contrib

        @pl.when(kk > 0)
        def _accum():
            acc_ref[...] += contrib

        @pl.when(kk == pl.num_programs(2) - 1)
        def _finish():
            o_ref[...] = _epilogue(acc_ref[...], epi_ref, epi_relu).astype(o_ref.dtype)

    return kernel


def _fused_matmul(a, b, pro_sb, epi_sb, epi_relu, out_dtype, pro_bf16=False):
    """a:(M,K), b:(K,N) bf16; pro_sb:(2,K) scale/shift on A (BN+ReLU prologue),
    epi_sb:(2,N) scale/shift on the output (BN epilogue).  Returns (M,N)."""
    M, K = a.shape
    N = b.shape[1]

    # Lane-dense K: zero-pad (padded lanes contribute 0; pro_sb pads are 0*0+0=0).
    Kp = _round_up(K, 128)
    if Kp != K:
        a = jnp.pad(a, ((0, 0), (0, Kp - K)))
        b = jnp.pad(b, ((0, Kp - K), (0, 0)))
        if pro_sb is not None:
            pro_sb = jnp.pad(pro_sb, ((0, 0), (0, Kp - K)))

    # Row tile: 16-aligned; pad M to the tile multiple (no divisor hunt).
    tm = _round_up(M, 16) if M <= 1024 else 512
    Mp = _round_up(M, tm)
    if Mp != M:
        a = jnp.pad(a, ((0, Mp - M), (0, 0)))

    tn = N if N <= 512 else 512
    Np = _round_up(N, tn)
    if Np != N:
        b = jnp.pad(b, ((0, 0), (0, Np - N)))
        if epi_sb is not None:
            epi_sb = jnp.pad(epi_sb, ((0, 0), (0, Np - N)))

    has_pro = pro_sb is not None
    has_epi = epi_sb is not None

    if Kp <= 2048:                  # every matmul in this network: one K step
        in_specs = [pl.BlockSpec((tm, Kp), lambda i, j: (i, 0)),
                    pl.BlockSpec((Kp, tn), lambda i, j: (0, j))]
        args = [a, b]
        if has_pro:
            in_specs.append(pl.BlockSpec((2, Kp), lambda i, j: (0, 0)))
            args.append(pro_sb)
        if has_epi:
            in_specs.append(pl.BlockSpec((2, tn), lambda i, j: (0, j)))
            args.append(epi_sb)
        out = pl.pallas_call(
            _make_mm1_kernel(has_pro, pro_bf16, has_epi, epi_relu),
            out_shape=jax.ShapeDtypeStruct((Mp, Np), out_dtype),
            grid=(Mp // tm, Np // tn),
            in_specs=in_specs,
            out_specs=pl.BlockSpec((tm, tn), lambda i, j: (i, j)),
            compiler_params=_cparams(("parallel", "parallel")),
        )(*args)
    else:                           # generic fallback (unused by this net)
        tk = 512
        Kq = _round_up(Kp, tk)
        if Kq != Kp:
            a = jnp.pad(a, ((0, 0), (0, Kq - Kp)))
            b = jnp.pad(b, ((0, Kq - Kp), (0, 0)))
            if has_pro:
                pro_sb = jnp.pad(pro_sb, ((0, 0), (0, Kq - Kp)))
        nk = Kq // tk
        in_specs = [pl.BlockSpec((tm, tk), lambda i, j, k: (i, k)),
                    pl.BlockSpec((tk, tn), lambda i, j, k: (k, j))]
        args = [a, b]
        if has_pro:
            in_specs.append(pl.BlockSpec((2, tk), lambda i, j, k: (0, k)))
            args.append(pro_sb)
        if has_epi:
            in_specs.append(pl.BlockSpec((2, tn), lambda i, j, k: (0, j)))
            args.append(epi_sb)
        out = pl.pallas_call(
            _make_mmk_kernel(has_pro, pro_bf16, has_epi, epi_relu),
            out_shape=jax.ShapeDtypeStruct((Mp, Np), out_dtype),
            grid=(Mp // tm, Np // tn, nk),
            in_specs=in_specs,
            out_specs=pl.BlockSpec((tm, tn), lambda i, j, k: (i, j)),
            scratch_shapes=[pltpu.VMEM((tm, tn), jnp.float32)],
            compiler_params=_cparams(("parallel", "parallel", "arbitrary")),
        )(*args)

    return out[:M, :N]


@functools.partial(jax.jit, static_argnames=("epi_relu",))
def conv1x1(x, w_mat, pro_sb=None, epi_sb=None, *, epi_relu=False):
    """1x1 conv as channel matmul with fused input BN+ReLU (prologue) and
    output BN(+ReLU) (epilogue).  x: (N,H,W,Cin) bf16; w_mat: (Cin,Cout) bf16."""
    N, H, W, C = x.shape
    Cout = w_mat.shape[1]
    a = x.reshape(N * H * W, C)
    pro_bf16 = (pro_sb is not None) and _BF16_VPU
    pro = pro_sb.astype(jnp.bfloat16) if pro_bf16 else pro_sb
    out = _fused_matmul(a, w_mat, pro, epi_sb, epi_relu, jnp.bfloat16,
                        pro_bf16=pro_bf16)
    return out.reshape(N, H, W, Cout)


@functools.partial(jax.jit, static_argnames=("kh", "kw", "stride", "padding"))
def conv_im2col_bn_relu(x, w_mat, epi_sb, *, kh, kw, stride, padding):
    """Strided KxK conv (stem only, Cin=3) via im2col + fused matmul + BN+ReLU."""
    N, H, W, Cin = x.shape
    Cout = w_mat.shape[1]
    if padding:
        x = jnp.pad(x, ((0, 0), (padding, padding), (padding, padding), (0, 0)))
    Hp, Wp = x.shape[1], x.shape[2]
    Ho = (Hp - kh) // stride + 1
    Wo = (Wp - kw) // stride + 1
    cols = [x[:, i:i + stride * Ho:stride, j:j + stride * Wo:stride, :]
            for i in range(kh) for j in range(kw)]
    a = jnp.concatenate(cols, axis=-1).reshape(N * Ho * Wo, kh * kw * Cin)
    out = _fused_matmul(a, w_mat, None, epi_sb, True, jnp.bfloat16)
    return out.reshape(N, Ho, Wo, Cout)


# ----------------------------------------------------------------------------
# 3x3 / stride-1 / pad-1 conv: one wide MXU matmul + 9 shifted output adds
# ----------------------------------------------------------------------------
def _make_conv3x3_kernel(wp, m, cout):
    def kernel(x_ref, w_ref, o_ref, p_ref, acc_ref):
        # One wide matmul for all 9 taps: (L,C) @ (C, 9*cout) -> fills the MXU.
        p_ref[...] = jnp.dot(x_ref[0], w_ref[...],
                             preferred_element_type=jnp.float32)
        t = 0
        for di in range(3):
            for dj in range(3):
                off = di * wp + dj                      # static per-tap row offset
                blk = p_ref[off:off + m, t * cout:(t + 1) * cout]
                if t == 0:
                    acc_ref[...] = blk
                else:
                    acc_ref[...] += blk
                t += 1
        o_ref[0] = acc_ref[...].astype(o_ref.dtype)

    return kernel


@jax.jit
def conv3x3_same(x, wf):
    """3x3 conv (stride 1, pad 1, no bias).  wf: (C, 9*Cout) tap-major weights.
    The padded image is flattened to (Hp*Wp, C) rows; the 9 taps become shifted
    adds of 32-wide output column groups of a single (L,C)@(C,288) matmul."""
    N, H, W, C = x.shape
    Cout = wf.shape[1] // 9
    Hp, Wp = H + 2, W + 2
    xp = jnp.pad(x, ((0, 0), (1, 1), (1, 1), (0, 0)))
    xf = xp.reshape(N, Hp * Wp, C)
    xf = jnp.pad(xf, ((0, 0), (0, 2), (0, 0)))          # guard rows for last taps
    m = H * Wp                                          # flat outputs per image
    L = Hp * Wp + 2
    out = pl.pallas_call(
        _make_conv3x3_kernel(Wp, m, Cout),
        out_shape=jax.ShapeDtypeStruct((N, m, Cout), x.dtype),
        grid=(N,),
        in_specs=[pl.BlockSpec((1, L, C), lambda n: (n, 0, 0)),
                  pl.BlockSpec((C, 9 * Cout), lambda n: (0, 0))],
        out_specs=pl.BlockSpec((1, m, Cout), lambda n: (n, 0, 0)),
        scratch_shapes=[pltpu.VMEM((L, 9 * Cout), jnp.float32),
                        pltpu.VMEM((m, Cout), jnp.float32)],
        compiler_params=_cparams(("parallel",)),
    )(xf, wf)
    return out.reshape(N, H, Wp, Cout)[:, :, :W, :]     # drop row-wrap garbage cols


# ----------------------------------------------------------------------------
# pooling (single-read, lane-packed column pairs), GAP, classifier head
# ----------------------------------------------------------------------------
def _maxpool_stem_kernel(a_ref, b_ref, o_ref):
    # a: padded rows (2i, 2i+1); b: padded rows (2i+2, 2i+3) (only its row 0 used).
    # Lanes pack column pairs (2j, 2j+1) of the 64-channel stem features.
    r0 = a_ref[0, 0].astype(jnp.float32)
    r1 = a_ref[0, 1].astype(jnp.float32)
    r2 = b_ref[0, 0].astype(jnp.float32)
    v = jnp.maximum(jnp.maximum(r0, r1), r2)            # (Wh+1, 2C)
    c = v.shape[-1] // 2
    res = jnp.maximum(jnp.maximum(v[1:, :c], v[1:, c:]), v[:-1, c:])
    o_ref[0, 0] = res.astype(o_ref.dtype)


@jax.jit
def maxpool3x3_s2_p1(x):
    """nn.MaxPool2d(3, stride=2, padding=1) on the stem features, single read."""
    N, Hs, Ws, C = x.shape
    assert Hs % 2 == 0 and Ws % 2 == 0 and (2 * C) % 128 == 0
    Ho, Wo, Wh = Hs // 2, Ws // 2, Ws // 2
    u = x.reshape(N, Hs, Wh, 2 * C)                     # pack adjacent cols to lanes
    up = jnp.pad(u, ((0, 0), (1, 1), (1, 0), (0, 0)),
                 constant_values=-jnp.inf)              # -inf halo rows / lead column
    blk = (1, 2, Wh + 1, 2 * C)
    out = pl.pallas_call(
        _maxpool_stem_kernel,
        out_shape=jax.ShapeDtypeStruct((N, Ho, Wo, C), x.dtype),
        grid=(N, Ho),
        in_specs=[pl.BlockSpec(blk, lambda n, i: (n, i, 0, 0)),
                  pl.BlockSpec(blk, lambda n, i: (n, i + 1, 0, 0))],
        out_specs=pl.BlockSpec((1, 1, Wo, C), lambda n, i: (n, i, 0, 0)),
        compiler_params=_cparams(("parallel", "parallel")),
    )(up, up)
    return out


def _make_avgpool_kernel(th, C):
    def kernel(x_ref, o_ref):
        for r in range(th):
            a = x_ref[0, 2 * r].astype(jnp.float32)     # (Wo, 2C)
            b = x_ref[0, 2 * r + 1].astype(jnp.float32)
            s = (a[:, :C] + a[:, C:] + b[:, :C] + b[:, C:]) * 0.25
            o_ref[0, r] = s.astype(o_ref.dtype)

    return kernel


@jax.jit
def avgpool2x2_s2(x):
    """nn.AvgPool2d(2, stride=2): input read once, column pairs packed into lanes."""
    N, H, W, C = x.shape
    assert H % 2 == 0 and W % 2 == 0 and C % 128 == 0
    Ho, Wo = H // 2, W // 2
    xr = x.reshape(N, H, Wo, 2 * C)
    th = _pick_div(Ho, 8, 1)
    out = pl.pallas_call(
        _make_avgpool_kernel(th, C),
        out_shape=jax.ShapeDtypeStruct((N, Ho, Wo, C), x.dtype),
        grid=(N, Ho // th),
        in_specs=[pl.BlockSpec((1, 2 * th, Wo, 2 * C), lambda n, h: (n, h, 0, 0))],
        out_specs=pl.BlockSpec((1, th, Wo, C), lambda n, h: (n, h, 0, 0)),
        compiler_params=_cparams(("parallel", "parallel")),
    )(xr)
    return out


def _gap_bn_relu_kernel(x_ref, sb_ref, o_ref):
    x = x_ref[...].astype(jnp.float32)                  # (N, HW, C)
    s = sb_ref[0:1, :][None]
    t = sb_ref[1:2, :][None]
    o_ref[...] = jnp.mean(jnp.maximum(x * s + t, 0.0), axis=1)


@jax.jit
def gap_bn_relu(x, sb):
    """norm5 (folded BN) + ReLU + adaptive_avg_pool2d((1,1)) + flatten, fused."""
    N, H, W, C = x.shape
    xf = x.reshape(N, H * W, C)
    return pl.pallas_call(
        _gap_bn_relu_kernel,
        out_shape=jax.ShapeDtypeStruct((N, C), jnp.float32),
        grid=(1,),
        in_specs=[pl.BlockSpec((N, H * W, C), lambda i: (0, 0, 0)),
                  pl.BlockSpec((2, C), lambda i: (0, 0))],
        out_specs=pl.BlockSpec((N, C), lambda i: (0, 0)),
        compiler_params=_cparams(("arbitrary",)),
    )(xf, sb)


def _classifier_kernel(f_ref, w1_ref, sb1_ref, w2_ref, sb2_ref, w3_ref, b3_ref, o_ref):
    # Linear -> BN1d(folded) -> ReLU -> [Dropout(0.5): identity in eval]
    # -> Linear -> BN1d(folded) -> ReLU -> Linear
    sb1 = sb1_ref[...]
    sb2 = sb2_ref[...]
    h = jnp.dot(f_ref[...], w1_ref[...], preferred_element_type=jnp.float32)
    h = jnp.maximum(h * sb1[0:1, :] + sb1[1:2, :], 0.0)
    h = jnp.dot(h, w2_ref[...], preferred_element_type=jnp.float32)
    h = jnp.maximum(h * sb2[0:1, :] + sb2[1:2, :], 0.0)
    o_ref[...] = jnp.dot(h, w3_ref[...], preferred_element_type=jnp.float32) + b3_ref[...]


@jax.jit
def classifier_head(feat, cp):
    eps = 1e-5
    N = feat.shape[0]
    s1 = cp["bn1"]["gamma"] * jax.lax.rsqrt(cp["bn1"]["var"] + eps)
    t1 = (cp["fc1_b"] - cp["bn1"]["mean"]) * s1 + cp["bn1"]["beta"]
    s2 = cp["bn2"]["gamma"] * jax.lax.rsqrt(cp["bn2"]["var"] + eps)
    t2 = (cp["fc2_b"] - cp["bn2"]["mean"]) * s2 + cp["bn2"]["beta"]
    sb1 = jnp.stack([s1, t1], axis=0)
    sb2 = jnp.stack([s2, t2], axis=0)
    fp = _pad2d(feat, 8, 128)
    w1, w2 = cp["fc1_w"], cp["fc2_w"]
    w3 = _pad2d(cp["fc3_w"], 128, 128)
    b3 = _pad2d(cp["fc3_b"][None, :], 1, 128)
    Mp = fp.shape[0]
    out = pl.pallas_call(
        _classifier_kernel,
        out_shape=jax.ShapeDtypeStruct((Mp, w3.shape[1]), jnp.float32),
        grid=(1,),
        in_specs=[_full_spec(fp.shape), _full_spec(w1.shape), _full_spec(sb1.shape),
                  _full_spec(w2.shape), _full_spec(sb2.shape),
                  _full_spec(w3.shape), _full_spec(b3.shape)],
        out_specs=_full_spec((Mp, w3.shape[1])),
        compiler_params=_cparams(("arbitrary",)),
    )(fp, w1, sb1, w2, sb2, w3, b3)
    return out[:N, :2]


# ----------------------------------------------------------------------------
# deterministic parameter init (DenseNet-121 shapes; no checkpoint load)
# ----------------------------------------------------------------------------
def init_params(seed=42):
    rng = np.random.default_rng(seed)
    eps = 1e-5

    def conv_w(kh, kw, cin, cout):
        std = math.sqrt(2.0 / (kh * kw * cin))
        return rng.normal(0.0, std, (kh, kw, cin, cout)).astype(np.float32)

    def bn_fold_sb(c, c_pad=None):
        # eval-mode BatchNorm (running stats) folded to (scale, shift).
        gamma = (1.0 + 0.01 * rng.normal(size=c)).astype(np.float32)
        beta = (0.01 * rng.normal(size=c)).astype(np.float32)
        mean = np.zeros(c, np.float32)
        var = np.ones(c, np.float32)
        scale = gamma / np.sqrt(var + eps)
        shift = beta - mean * scale
        if c_pad is not None and c_pad > c:      # layout-only padding: identity
            scale = np.pad(scale, (0, c_pad - c), constant_values=1.0)
            shift = np.pad(shift, (0, c_pad - c))
        return jnp.asarray(np.stack([scale, shift], axis=0))     # (2, c_pad) f32

    def bn_p(c):
        return dict(gamma=jnp.asarray((1.0 + 0.01 * rng.normal(size=c)).astype(np.float32)),
                    beta=jnp.asarray((0.01 * rng.normal(size=c)).astype(np.float32)),
                    mean=jnp.zeros(c, jnp.float32),
                    var=jnp.ones(c, jnp.float32))

    def linear_p(cin, cout):
        bound = 1.0 / math.sqrt(cin)
        w = rng.uniform(-bound, bound, (cin, cout)).astype(np.float32)
        b = rng.uniform(-bound, bound, (cout,)).astype(np.float32)
        return jnp.asarray(w), jnp.asarray(b)

    growth, bn_size = 32, 4
    block_cfg = (6, 12, 24, 16)
    num_feat = 64

    params = dict(
        conv0=jnp.asarray(conv_w(7, 7, 3, num_feat).reshape(7 * 7 * 3, num_feat),
                          dtype=jnp.bfloat16),
        norm0_sb=bn_fold_sb(num_feat),
        blocks=[], transitions=[])

    for bi, n_layers in enumerate(block_cfg):
        block = []
        for li in range(n_layers):
            cin = num_feat + li * growth
            cin_pad = _round_up(cin, 128)
            w1 = conv_w(1, 1, cin, bn_size * growth).reshape(cin, bn_size * growth)
            w1 = np.pad(w1, ((0, cin_pad - cin), (0, 0)))        # zero padded rows
            w2 = conv_w(3, 3, bn_size * growth, growth)          # (3,3,128,32)
            w2 = np.transpose(w2, (2, 0, 1, 3)).reshape(bn_size * growth, 9 * growth)
            block.append(dict(
                sb1=bn_fold_sb(cin, cin_pad),                    # norm1 (conv1 prologue)
                w1=jnp.asarray(w1, dtype=jnp.bfloat16),          # 1x1 bottleneck -> 128
                sb2=bn_fold_sb(bn_size * growth),                # norm2 (conv1 epilogue)
                w2=jnp.asarray(w2, dtype=jnp.bfloat16)))         # 3x3 tap-major (128,288)
        params["blocks"].append(block)
        num_feat = num_feat + n_layers * growth
        if bi != len(block_cfg) - 1:
            wt = conv_w(1, 1, num_feat, num_feat // 2).reshape(num_feat, num_feat // 2)
            params["transitions"].append(dict(
                sb=bn_fold_sb(num_feat),
                w=jnp.asarray(wt, dtype=jnp.bfloat16)))
            num_feat //= 2

    params["norm5_sb"] = bn_fold_sb(num_feat)                    # num_feat == 1024
    fc1_w, fc1_b = linear_p(num_feat, 512)
    fc2_w, fc2_b = linear_p(512, 256)
    fc3_w, fc3_b = linear_p(256, 2)
    params["classifier"] = dict(fc1_w=fc1_w, fc1_b=fc1_b, bn1=bn_p(512),
                                fc2_w=fc2_w, fc2_b=fc2_b, bn2=bn_p(256),
                                fc3_w=fc3_w, fc3_b=fc3_b)
    return params


# ----------------------------------------------------------------------------
# full forward pass (wrap the whole thing in one jax.jit at the call site)
# ----------------------------------------------------------------------------
def pneumonia_model_forward(x_nchw, params):
    """PneumoniaModel.forward.  x_nchw: (N,3,H,W) f32 (PyTorch NCHW) -> (N,2) logits."""
    x = jnp.transpose(x_nchw, (0, 2, 3, 1)).astype(jnp.bfloat16)   # NHWC, bf16 acts

    # ----- stem: conv0 7x7/2 (+ fused norm0+ReLU) + maxpool 3x3/2 -----
    x = conv_im2col_bn_relu(x, params["conv0"], params["norm0_sb"],
                            kh=7, kw=7, stride=2, padding=3)
    x = maxpool3x3_s2_p1(x)

    # ----- dense blocks: features kept in a persistently lane-padded slab -----
    cin = x.shape[-1]                                  # true (unpadded) channel count
    n_blocks = len(params["blocks"])
    for bi, block in enumerate(params["blocks"]):
        for layer in block:
            cpad = layer["sb1"].shape[1]               # lane-padded input width
            if x.shape[-1] < cpad:
                x = jnp.pad(x, ((0, 0), (0, 0), (0, 0), (0, cpad - x.shape[-1])))
            # norm1+ReLU (prologue) -> 1x1 conv -> norm2+ReLU (epilogue): one kernel
            y = conv1x1(x, layer["w1"], pro_sb=layer["sb1"], epi_sb=layer["sb2"],
                        epi_relu=True)
            y = conv3x3_same(y, layer["w2"])           # 3x3 conv -> 32 new features
            if x.shape[-1] < cin + 32:                 # grow the padded slab if needed
                grow = _round_up(cin + 32, 128) - x.shape[-1]
                x = jnp.pad(x, ((0, 0), (0, 0), (0, 0), (0, grow)))
            x = jax.lax.dynamic_update_slice(x, y, (0, 0, 0, cin))
            cin += 32
        if bi != n_blocks - 1:
            tr = params["transitions"][bi]
            # transition: norm+ReLU (prologue) -> 1x1 conv, then 2x2 avgpool
            x = conv1x1(x, tr["w"], pro_sb=tr["sb"], epi_sb=None, epi_relu=False)
            x = avgpool2x2_s2(x)
            cin = x.shape[-1]

    # ----- norm5 + ReLU + global average pool (fused), then classifier head -----
    feat = gap_bn_relu(x, params["norm5_sb"])
    # TODO(synk): Dropout(0.5) training-mode masking not implemented (eval identity).
    return classifier_head(feat, params["classifier"])


# ----------------------------------------------------------------------------
if __name__ == "__main__":
    params = init_params(seed=42)
    key = jax.random.PRNGKey(0)
    # small-but-valid image size (adaptive avg-pool makes the net size-agnostic)
    x = jax.random.normal(key, (2, 3, 32, 32), jnp.float32)        # NCHW like PyTorch

    forward = jax.jit(pneumonia_model_forward)                     # whole-graph jit
    logits = forward(x, params)
    logits = jax.block_until_ready(logits)

    assert logits.shape == (2, 2), logits.shape
    assert bool(jnp.all(jnp.isfinite(logits)))
    print("KERNEL_OK")
</pallas_src>

<mosaic_0001>
module attributes {stable_mosaic.version = 11 : i64} {
  func.func @kernel(%arg0: i32, %arg1: i32, %arg2: memref<512x256xbf16, #tpu.memory_space<vmem>>, %arg3: memref<256x64xbf16, #tpu.memory_space<vmem>>, %arg4: memref<2x64xf32, #tpu.memory_space<vmem>>, %arg5: memref<512x64xbf16, #tpu.memory_space<vmem>>) attributes {dimension_semantics = [#tpu.dimension_semantics<parallel>, #tpu.dimension_semantics<parallel>], iteration_bounds = array<i64: 1, 1>, scalar_prefetch = 0 : i64, scratch_operands = 0 : i64, tpu.core_type = #tpu.core_type<tc>, window_params = [{transform_indices = @transform_0, window_bounds = array<i64: 512, 256>}, {transform_indices = @transform_1, window_bounds = array<i64: 256, 64>}, {transform_indices = @transform_2, window_bounds = array<i64: 2, 64>}, {transform_indices = @transform_3, window_bounds = array<i64: 512, 64>}]} {
    %c0 = arith.constant 0 : index
    %c0_0 = arith.constant 0 : index
    %0 = vector.load %arg2[%c0, %c0_0] : memref<512x256xbf16, #tpu.memory_space<vmem>>, vector<512x256xbf16>
    %c0_1 = arith.constant 0 : index
    %c0_2 = arith.constant 0 : index
    %1 = vector.load %arg3[%c0_1, %c0_2] : memref<256x64xbf16, #tpu.memory_space<vmem>>, vector<256x64xbf16>
    %cst = arith.constant dense<0.000000e+00> : vector<512x64xf32>
    %2 = tpu.matmul %0, %1, %cst {dimension_numbers = #tpu.dot_dimension_numbers<[1], [0], [0], [1], [0, 0, 1, 1], [], []>} : vector<512x256xbf16>, vector<256x64xbf16>, vector<512x64xf32> -> vector<512x64xf32>
    %c0_3 = arith.constant 0 : index
    %c0_4 = arith.constant 0 : index
    %3 = vector.load %arg4[%c0_3, %c0_4] : memref<2x64xf32, #tpu.memory_space<vmem>>, vector<1x64xf32>
    %4 = vector.broadcast %3 : vector<1x64xf32> to vector<512x64xf32>
    %5 = arith.mulf %2, %4 : vector<512x64xf32>
    %c1 = arith.constant 1 : index
    %c0_5 = arith.constant 0 : index
    %6 = vector.load %arg4[%c1, %c0_5] : memref<2x64xf32, #tpu.memory_space<vmem>>, vector<1x64xf32>
    %7 = vector.broadcast %6 : vector<1x64xf32> to vector<512x64xf32>
    %8 = arith.addf %5, %7 : vector<512x64xf32>
    %cst_6 = arith.constant 0.000000e+00 : f32
    %9 = vector.broadcast %cst_6 : f32 to vector<512x64xf32>
    %10 = arith.maximumf %8, %9 : vector<512x64xf32>
    %11 = arith.truncf %10 : vector<512x64xf32> to vector<512x64xbf16>
    %c0_7 = arith.constant 0 : index
    %c0_8 = arith.constant 0 : index
    %12 = vector.load %arg5[%c0_7, %c0_8] : memref<512x64xbf16, #tpu.memory_space<vmem>>, vector<512x64xbf16>
    tpu.vector_store %arg5[%c0_7, %c0_8], %11 {strides = array<i32>} : memref<512x64xbf16, #tpu.memory_space<vmem>>, vector<512x64xbf16>,
    return
  }
  func.func @transform_0(%arg0: i32, %arg1: i32) -> (i32, i32) {
    %c0_i32 = arith.constant 0 : i32
    %c0_i32_0 = arith.constant 0 : i32
    return %arg0, %c0_i32 : i32, i32
  }
  func.func @transform_1(%arg0: i32, %arg1: i32) -> (i32, i32) {
    %c0_i32 = arith.constant 0 : i32
    %c0_i32_0 = arith.constant 0 : i32
    return %c0_i32, %arg1 : i32, i32
  }
  func.func @transform_2(%arg0: i32, %arg1: i32) -> (i32, i32) {
    %c0_i32 = arith.constant 0 : i32
    %c0_i32_0 = arith.constant 0 : i32
    return %c0_i32, %arg1 : i32, i32
  }
  func.func @transform_3(%arg0: i32, %arg1: i32) -> (i32, i32) {
    %c0_i32 = arith.constant 0 : i32
    return %arg0, %arg1 : i32, i32
  }
}

</mosaic_0001>

<bundles_post_ra>
// kernel: conv_im2col_bn_relu.1
= control target key start
LH: loop header
LB: loop body
LE: loop exit
PB: predicated region body
PF: predicated region fallthrough
CT: control target
= control target key end

     0   :  { %v1738_v1 = vmov 0   ;;  %s2248_s0 = inlined_call_operand.vmem [shape: bf16[512,256], index: 0, kind: input, shape index: {}]   ;;  %s2249_s1 = inlined_call_operand.vmem [shape: bf16[256,64], index: 1, kind: input, shape index: {}]   ;;  %s2250_s2 = inlined_call_operand.vmem [shape: f32[2,64], index: 2, kind: input, shape index: {}]   ;;  %s2251_s3 = inlined_call_operand.hbm [shape: bf16[512,64], index: 3, kind: output, shape index: {}]  }
   0x1   :  { %v1602_v0 = vld [vmem:[%s2249_s1] sm:$0xff]   ;;  %528 = vmatprep.subr.bf16.mxu0 %v1738_v1  ;;  %1566 = vmatprep.subr.bf16.mxu1 %v1738_v1  ;;  %v1603_v2 = vld [vmem:[%s2249_s1 + $0x8] sm:$0xff]   ;;  %v1604_v3 = vld [vmem:[%s2249_s1 + $0x10] sm:$0xff]  }
   0x2   :  { %529 = vmatpush1.bf16.msra.mxu0 %v1602_v0  ;;  %1582 = vmatpush1.bf16.msra.mxu1 %v1602_v0  ;;  %v1605_v4 = vld [vmem:[%s2249_s1 + $0x18] sm:$0xff]   ;;  %v1606_v5 = vld [vmem:[%s2249_s1 + $0x20] sm:$0xff]   ;;  %v1607_v7 = vld [vmem:[%s2249_s1 + $0x28] sm:$0xff]  }
   0x3   :  { %530 = vmatprep.subr.bf16.mxu0 %v1738_v1  ;;  %1567 = vmatprep.subr.bf16.mxu1 %v1738_v1  ;;  %v1620_v6 = vld [vmem:[%s2248_s0 + $0x4] ss:$8 sps:$4 sm:$0xff]   ;;  %v1608_v9 = vld [vmem:[%s2249_s1 + $0x30] sm:$0xff]   ;;  %v1609_v10 = vld [vmem:[%s2249_s1 + $0x38] sm:$0xff]  }
   0x4   :  { %v1623_v8 = vld [vmem:[%s2248_s0 + $0x104] ss:$8 sps:$4 sm:$0xff]   ;;  %560 = vmatprep.mubr.bf16.mxu0 %v1620_v6  ;;  %v1612_v13 = vld [vmem:[%s2249_s1 + $0x50] sm:$0xff]   ;;  %v1613_v14 = vld [vmem:[%s2249_s1 + $0x58] sm:$0xff]  }
   0x5   :  { %688 = vmatprep.mubr.bf16.mxu1 %v1623_v8  ;;  %v1610_v11 = vld [vmem:[%s2249_s1 + $0x40] sm:$0xff]   ;;  %v1611_v12 = vld [vmem:[%s2249_s1 + $0x48] sm:$0xff]   ;;  %v1616_v17 = vld [vmem:[%s2249_s1 + $0x70] sm:$0xff]  }
   0x6   :  { %531 = vmatpush1.bf16.msra.mxu0 %v1603_v2  ;;  %1583 = vmatpush1.bf16.msra.mxu1 %v1603_v2  ;;  %v1614_v15 = vld [vmem:[%s2249_s1 + $0x60] sm:$0xff]   ;;  %v1615_v16 = vld [vmem:[%s2249_s1 + $0x68] sm:$0xff]   ;;  %v1617_v18 = vld [vmem:[%s2249_s1 + $0x78] sm:$0xff]  }
   0x7   :  { %532 = vmatprep.subr.bf16.mxu0 %v1738_v1  ;;  %1568 = vmatprep.subr.bf16.mxu1 %v1738_v1 }
   0xa   :  { %533 = vmatpush1.bf16.msra.mxu0 %v1604_v3  ;;  %1584 = vmatpush1.bf16.msra.mxu1 %v1604_v3 }
   0xb   :  { %534 = vmatprep.subr.bf16.mxu0 %v1738_v1  ;;  %1569 = vmatprep.subr.bf16.mxu1 %v1738_v1 }
   0xe   :  { %535 = vmatpush1.bf16.msra.mxu0 %v1605_v4  ;;  %1585 = vmatpush1.bf16.msra.mxu1 %v1605_v4 }
   0xf   :  { %536 = vmatprep.subr.bf16.mxu0 %v1738_v1  ;;  %1570 = vmatprep.subr.bf16.mxu1 %v1738_v1 }
  0x12   :  { %537 = vmatpush1.bf16.msra.mxu0 %v1606_v5  ;;  %1586 = vmatpush1.bf16.msra.mxu1 %v1606_v5 }
  0x13   :  { %538 = vmatprep.subr.bf16.mxu0 %v1738_v1  ;;  %1571 = vmatprep.subr.bf16.mxu1 %v1738_v1 }
  0x16   :  { %539 = vmatpush1.bf16.msra.mxu0 %v1607_v7  ;;  %1587 = vmatpush1.bf16.msra.mxu1 %v1607_v7 }
  0x17   :  { %540 = vmatprep.subr.bf16.mxu0 %v1738_v1  ;;  %1572 = vmatprep.subr.bf16.mxu1 %v1738_v1 }
  0x1a   :  { %541 = vmatpush1.bf16.msra.mxu0 %v1608_v9  ;;  %1588 = vmatpush1.bf16.msra.mxu1 %v1608_v9 }
  0x1b   :  { %542 = vmatprep.subr.bf16.mxu0 %v1738_v1  ;;  %1573 = vmatprep.subr.bf16.mxu1 %v1738_v1 }
  0x1e   :  { %543 = vmatpush1.bf16.msra.mxu0 %v1609_v10  ;;  %1589 = vmatpush1.bf16.msra.mxu1 %v1609_v10 }
  0x1f   :  { %544 = vmatprep.subr.bf16.mxu0 %v1738_v1  ;;  %1574 = vmatprep.subr.bf16.mxu1 %v1738_v1 }
  0x22   :  { %545 = vmatpush1.bf16.msra.mxu0 %v1610_v11  ;;  %1590 = vmatpush1.bf16.msra.mxu1 %v1610_v11 }
  0x23   :  { %546 = vmatprep.subr.bf16.mxu0 %v1738_v1  ;;  %1575 = vmatprep.subr.bf16.mxu1 %v1738_v1 }
  0x26   :  { %547 = vmatpush1.bf16.msra.mxu0 %v1611_v12  ;;  %1591 = vmatpush1.bf16.msra.mxu1 %v1611_v12 }
  0x27   :  { %548 = vmatprep.subr.bf16.mxu0 %v1738_v1  ;;  %1576 = vmatprep.subr.bf16.mxu1 %v1738_v1 }
  0x2a   :  { %549 = vmatpush1.bf16.msra.mxu0 %v1612_v13  ;;  %1592 = vmatpush1.bf16.msra.mxu1 %v1612_v13 }
  0x2b   :  { %550 = vmatprep.subr.bf16.mxu0 %v1738_v1  ;;  %1577 = vmatprep.subr.bf16.mxu1 %v1738_v1 }
  0x2e   :  { %551 = vmatpush1.bf16.msra.mxu0 %v1613_v14  ;;  %1593 = vmatpush1.bf16.msra.mxu1 %v1613_v14 }
  0x2f   :  { %552 = vmatprep.subr.bf16.mxu0 %v1738_v1  ;;  %1578 = vmatprep.subr.bf16.mxu1 %v1738_v1 }
  0x32   :  { %553 = vmatpush1.bf16.msra.mxu0 %v1614_v15  ;;  %1594 = vmatpush1.bf16.msra.mxu1 %v1614_v15 }
  0x33   :  { %554 = vmatprep.subr.bf16.mxu0 %v1738_v1  ;;  %1579 = vmatprep.subr.bf16.mxu1 %v1738_v1 }
  0x36   :  { %555 = vmatpush1.bf16.msra.mxu0 %v1615_v16  ;;  %1595 = vmatpush1.bf16.msra.mxu1 %v1615_v16 }
  0x37   :  { %556 = vmatprep.subr.bf16.mxu0 %v1738_v1  ;;  %1580 = vmatprep.subr.bf16.mxu1 %v1738_v1 }
  0x3a   :  { %557 = vmatpush1.bf16.msra.mxu0 %v1616_v17  ;;  %1596 = vmatpush1.bf16.msra.mxu1 %v1616_v17 }
  0x3b   :  { %8 = vsyncpa [#allocation3], 0  ;;  %558 = vmatprep.subr.bf16.mxu0 %v1738_v1  ;;  %1581 = vmatprep.subr.bf16.mxu1 %v1738_v1  ;;  %v1618_v19 = vld [vmem:[%s2248_s0] ss:$8 sps:$4 sm:$0xff]   ;;  %v1624_v21 = vld [vmem:[%s2248_s0 + $0x14] ss:$8 sps:$4 sm:$0xff]  }
  0x3c   :  { %v1621_v20 = vld [vmem:[%s2248_s0 + $0x100] ss:$8 sps:$4 sm:$0xff]   ;;  %v1626_v22 = vld [vmem:[%s2248_s0 + $0x114] ss:$8 sps:$4 sm:$0xff]   ;;  %v1628_v23 = vld [vmem:[%s2248_s0 + $0x10] ss:$8 sps:$4 sm:$0xff]  }
  0x3d   :  { %v1629_v24 = vld [vmem:[%s2248_s0 + $0x110] ss:$8 sps:$4 sm:$0xff]   ;;  %v1630_v25 = vld [vmem:[%s2248_s0 + $0x24] ss:$8 sps:$4 sm:$0xff]   ;;  %v1634_v27 = vld [vmem:[%s2248_s0 + $0x20] ss:$8 sps:$4 sm:$0xff]  }
  0x3e   :  { %559 = vmatpush1.bf16.msra.mxu0 %v1617_v18  ;;  %1597 = vmatpush1.bf16.msra.mxu1 %v1617_v18  ;;  %v1632_v26 = vld [vmem:[%s2248_s0 + $0x124] ss:$8 sps:$4 sm:$0xff]   ;;  %v1635_v28 = vld [vmem:[%s2248_s0 + $0x120] ss:$8 sps:$4 sm:$0xff]   ;;  %v1636_v29 = vld [vmem:[%s2248_s0 + $0x34] ss:$8 sps:$4 sm:$0xff]  }
  0x3f   :  { %v1638_v30 = vld [vmem:[%s2248_s0 + $0x134] ss:$8 sps:$4 sm:$0xff]   ;;  %v1640_v31 = vld [vmem:[%s2248_s0 + $0x30] ss:$8 sps:$4 sm:$0xff]   ;;  %v1642_v33 = vld [vmem:[%s2248_s0 + $0x44] ss:$8 sps:$4 sm:$0xff]  }
  0x40   :  { %v1641_v32 = vld [vmem:[%s2248_s0 + $0x130] ss:$8 sps:$4 sm:$0xff]   ;;  %v1644_v34 = vld [vmem:[%s2248_s0 + $0x144] ss:$8 sps:$4 sm:$0xff]   ;;  %v1646_v35 = vld [vmem:[%s2248_s0 + $0x40] ss:$8 sps:$4 sm:$0xff]  }
  0x41   :  { %561 = vmatmul.mubr.bf16.vlgmr.msra.gmra.mrb[0].mxu0 %v1618_v19  ;;  %689 = vmatmul.mubr.bf16.vlgmr.msra.gmra.mrb[0].mxu1 %v1621_v20  ;;  %v1647_v36 = vld [vmem:[%s2248_s0 + $0x140] ss:$8 sps:$4 sm:$0xff]   ;;  %v1648_v37 = vld [vmem:[%s2248_s0 + $0x54] ss:$8 sps:$4 sm:$0xff]   ;;  %v1652_v39 = vld [vmem:[%s2248_s0 + $0x50] ss:$8 sps:$4 sm:$0xff]  }
  0x42   :  { %568 = vmatprep.mubr.bf16.mxu0 %v1624_v21  ;;  %696 = vmatprep.mubr.bf16.mxu1 %v1626_v22  ;;  %v1650_v38 = vld [vmem:[%s2248_s0 + $0x154] ss:$8 sps:$4 sm:$0xff]   ;;  %v1653_v40 = vld [vmem:[%s2248_s0 + $0x150] ss:$8 sps:$4 sm:$0xff]   ;;  %v1654_v41 = vld [vmem:[%s2248_s0 + $0x64] ss:$8 sps:$4 sm:$0xff]  }
  0x43   :  { %v1656_v42 = vld [vmem:[%s2248_s0 + $0x164] ss:$8 sps:$4 sm:$0xff]   ;;  %v1658_v43 = vld [vmem:[%s2248_s0 + $0x60] ss:$8 sps:$4 sm:$0xff]   ;;  %v1660_v45 = vld [vmem:[%s2248_s0 + $0x74] ss:$8 sps:$4 sm:$0xff]  }
  0x44   :  { %v1659_v44 = vld [vmem:[%s2248_s0 + $0x160] ss:$8 sps:$4 sm:$0xff]   ;;  %v1662_v46 = vld [vmem:[%s2248_s0 + $0x174] ss:$8 sps:$4 sm:$0xff]   ;;  %v1664_v47 = vld [vmem:[%s2248_s0 + $0x70] ss:$8 sps:$4 sm:$0xff]  }
  0x45   :  { %v1665_v48 = vld [vmem:[%s2248_s0 + $0x170] ss:$8 sps:$4 sm:$0xff]   ;;  %v1666_v49 = vld [vmem:[%s2248_s0 + $0x84] ss:$8 sps:$4 sm:$0xff]   ;;  %v1670_v51 = vld [vmem:[%s2248_s0 + $0x80] ss:$8 sps:$4 sm:$0xff]  }
  0x46   :  { %v1668_v50 = vld [vmem:[%s2248_s0 + $0x184] ss:$8 sps:$4 sm:$0xff]   ;;  %v1671_v52 = vld [vmem:[%s2248_s0 + $0x180] ss:$8 sps:$4 sm:$0xff]   ;;  %v1672_v53 = vld [vmem:[%s2248_s0 + $0x94] ss:$8 sps:$4 sm:$0xff]  }
  0x47   :  { %v1674_v54 = vld [vmem:[%s2248_s0 + $0x194] ss:$8 sps:$4 sm:$0xff]   ;;  %v1676_v55 = vld [vmem:[%s2248_s0 + $0x90] ss:$8 sps:$4 sm:$0xff]   ;;  %v1678_v57 = vld [vmem:[%s2248_s0 + $0xa4] ss:$8 sps:$4 sm:$0xff]  }
  0x48   :  { %v1677_v56 = vld [vmem:[%s2248_s0 + $0x190] ss:$8 sps:$4 sm:$0xff]   ;;  %v1680_v58 = vld [vmem:[%s2248_s0 + $0x1a4] ss:$8 sps:$4 sm:$0xff]   ;;  %v1682_v59 = vld [vmem:[%s2248_s0 + $0xa0] ss:$8 sps:$4 sm:$0xff]  }
  0x49   :  { %569 = vmatmul.mubr.bf16.gmra.mrb[4].mxu0 %v1628_v23  ;;  %697 = vmatmul.mubr.bf16.gmra.mrb[4].mxu1 %v1629_v24  ;;  %v1683_v60 = vld [vmem:[%s2248_s0 + $0x1a0] ss:$8 sps:$4 sm:$0xff]   ;;  %v1684_v61 = vld [vmem:[%s2248_s0 + $0xb4] ss:$8 sps:$4 sm:$0xff]   ;;  %v1688_v63 = vld [vmem:[%s2248_s0 + $0xb0] ss:$8 sps:$4 sm:$0xff]  }
  0x4a   :  { %576 = vmatprep.mubr.bf16.mxu0 %v1630_v25  ;;  %704 = vmatprep.mubr.bf16.mxu1 %v1632_v26  ;;  %v1686_v62 = vld [vmem:[%s2248_s0 + $0x1b4] ss:$8 sps:$4 sm:$0xff]   ;;  %v1689_v0 = vld [vmem:[%s2248_s0 + $0x1b0] ss:$8 sps:$4 sm:$0xff]   ;;  %v1690_v1 = vld [vmem:[%s2248_s0 + $0xc4] ss:$8 sps:$4 sm:$0xff]  }
  0x4b   :  { %v1692_v2 = vld [vmem:[%s2248_s0 + $0x1c4] ss:$8 sps:$4 sm:$0xff]   ;;  %v1694_v3 = vld [vmem:[%s2248_s0 + $0xc0] ss:$8 sps:$4 sm:$0xff]   ;;  %v1696_v5 = vld [vmem:[%s2248_s0 + $0xd4] ss:$8 sps:$4 sm:$0xff]  }
  0x4c   :  { %v1695_v4 = vld [vmem:[%s2248_s0 + $0x1c0] ss:$8 sps:$4 sm:$0xff]   ;;  %v1698_v6 = vld [vmem:[%s2248_s0 + $0x1d4] ss:$8 sps:$4 sm:$0xff]   ;;  %v1700_v7 = vld [vmem:[%s2248_s0 + $0xd0] ss:$8 sps:$4 sm:$0xff]  }
  0x4d   :  { %v1701_v8 = vld [vmem:[%s2248_s0 + $0x1d0] ss:$8 sps:$4 sm:$0xff]   ;;  %v1702_v9 = vld [vmem:[%s2248_s0 + $0xe4] ss:$8 sps:$4 sm:$0xff]   ;;  %v1706_v11 = vld [vmem:[%s2248_s0 + $0xe0] ss:$8 sps:$4 sm:$0xff]  }
  0x4e   :  { %v1704_v10 = vld [vmem:[%s2248_s0 + $0x1e4] ss:$8 sps:$4 sm:$0xff]   ;;  %v1707_v12 = vld [vmem:[%s2248_s0 + $0x1e0] ss:$8 sps:$4 sm:$0xff]   ;;  %v1708_v13 = vld [vmem:[%s2248_s0 + $0xf4] ss:$8 sps:$4 sm:$0xff]  }
  0x4f   :  { %v1710_v14 = vld [vmem:[%s2248_s0 + $0x1f4] ss:$8 sps:$4 sm:$0xff]   ;;  %v1712_v15 = vld [vmem:[%s2248_s0 + $0xf0] ss:$8 sps:$4 sm:$0xff]   ;;  %v2037_v17 = vld [vmem:[%s2250_s2] ss:$0 sm:$0xff] }
  0x50   :  { %v1713_v16 = vld [vmem:[%s2248_s0 + $0x1f0] ss:$8 sps:$4 sm:$0xff]   ;;  %v2042_v19 = vld [vmem:[%s2250_s2 + $0x1] ss:$0 sm:$0xff]  ;;  %vm1275_vm0 = vcmask 519168   ;;  %s1739_s0 = smov [#allocation2]  }
  0x51   :  { %577 = vmatmul.mubr.bf16.gmra.mrb[8].mxu0 %v1634_v27  ;;  %705 = vmatmul.mubr.bf16.gmra.mrb[8].mxu1 %v1635_v28  ;;  %s1345_s2 = sshll.u32 %s1739_s0, 4  ;;  %s1346_s2 = int_to_ptr.vmem [resolvable:$true] %s1345_s2 }
  0x52   :  { %584 = vmatprep.mubr.bf16.mxu0 %v1636_v29  ;;  %712 = vmatprep.mubr.bf16.mxu1 %v1638_v30  ;;  %s1714_s9 = scalar_lea.vmem %s1346_s2, 4096  ;;  %p1719_p1 = scmp.lt.s32.totalorder %s1346_s2, %s1346_s2 }
  0x53   :  { %p1715_p0 = scmp.ne.s32.totalorder %s1346_s2, %s1714_s9  ;;  %p1720_p2 = scmp.lt.s32.totalorder %s1714_s9, %s1714_s9 }
  0x55   :  { %p1721_p3 = por %p1720_p2, %p1719_p1 }
  0x57   :  { %p1722_p4 = pnand %p1721_p3, %p1715_p0 }
  0x59   :  { %585 = vmatmul.mubr.bf16.gmra.mrb[12].mxu0 %v1640_v31  ;;  %713 = vmatmul.mubr.bf16.gmra.mrb[12].mxu1 %v1641_v32 }
  0x5a   :  { %592 = vmatprep.mubr.bf16.mxu0 %v1642_v33  ;;  %720 = vmatprep.mubr.bf16.mxu1 %v1644_v34 }
  0x61   :  { %593 = vmatmul.mubr.bf16.gmra.mrb[16].mxu0 %v1646_v35  ;;  %721 = vmatmul.mubr.bf16.gmra.mrb[16].mxu1 %v1647_v36 }
  0x62   :  { %600 = vmatprep.mubr.bf16.mxu0 %v1648_v37  ;;  %728 = vmatprep.mubr.bf16.mxu1 %v1650_v38 }
  0x69   :  { %601 = vmatmul.mubr.bf16.gmra.mrb[20].mxu0 %v1652_v39  ;;  %729 = vmatmul.mubr.bf16.gmra.mrb[20].mxu1 %v1653_v40 }
  0x6a   :  { %608 = vmatprep.mubr.bf16.mxu0 %v1654_v41  ;;  %736 = vmatprep.mubr.bf16.mxu1 %v1656_v42 }
  0x71   :  { %609 = vmatmul.mubr.bf16.gmra.mrb[24].mxu0 %v1658_v43  ;;  %737 = vmatmul.mubr.bf16.gmra.mrb[24].mxu1 %v1659_v44 }
  0x72   :  { %616 = vmatprep.mubr.bf16.mxu0 %v1660_v45  ;;  %744 = vmatprep.mubr.bf16.mxu1 %v1662_v46 }
  0x79   :  { %617 = vmatmul.mubr.bf16.gmra.mrb[28].mxu0 %v1664_v47  ;;  %745 = vmatmul.mubr.bf16.gmra.mrb[28].mxu1 %v1665_v48 }
  0x7a   :  { %624 = vmatprep.mubr.bf16.mxu0 %v1666_v49  ;;  %752 = vmatprep.mubr.bf16.mxu1 %v1668_v50 }
  0x81   :  { %625 = vmatmul.mubr.bf16.gmra.mrb[32].mxu0 %v1670_v51  ;;  %753 = vmatmul.mubr.bf16.gmra.mrb[32].mxu1 %v1671_v52 }
  0x82   :  { %632 = vmatprep.mubr.bf16.mxu0 %v1672_v53  ;;  %760 = vmatprep.mubr.bf16.mxu1 %v1674_v54 }
  0x89   :  { %633 = vmatmul.mubr.bf16.gmra.mrb[36].mxu0 %v1676_v55  ;;  %761 = vmatmul.mubr.bf16.gmra.mrb[36].mxu1 %v1677_v56 }
  0x8a   :  { %640 = vmatprep.mubr.bf16.mxu0 %v1678_v57  ;;  %768 = vmatprep.mubr.bf16.mxu1 %v1680_v58 }
  0x91   :  { %641 = vmatmul.mubr.bf16.gmra.mrb[40].mxu0 %v1682_v59  ;;  %769 = vmatmul.mubr.bf16.gmra.mrb[40].mxu1 %v1683_v60 }
  0x92   :  { %648 = vmatprep.mubr.bf16.mxu0 %v1684_v61  ;;  %776 = vmatprep.mubr.bf16.mxu1 %v1686_v62 }
  0x99   :  { %649 = vmatmul.mubr.bf16.gmra.mrb[44].mxu0 %v1688_v63  ;;  %777 = vmatmul.mubr.bf16.gmra.mrb[44].mxu1 %v1689_v0 }
  0x9a   :  { %656 = vmatprep.mubr.bf16.mxu0 %v1690_v1  ;;  %784 = vmatprep.mubr.bf16.mxu1 %v1692_v2 }
  0xa1   :  { %657 = vmatmul.mubr.bf16.gmra.mrb[48].mxu0 %v1694_v3  ;;  %785 = vmatmul.mubr.bf16.gmra.mrb[48].mxu1 %v1695_v4 }
  0xa2   :  { %664 = vmatprep.mubr.bf16.mxu0 %v1696_v5  ;;  %792 = vmatprep.mubr.bf16.mxu1 %v1698_v6 }
  0xa9   :  { %665 = vmatmul.mubr.bf16.gmra.mrb[52].mxu0 %v1700_v7  ;;  %793 = vmatmul.mubr.bf16.gmra.mrb[52].mxu1 %v1701_v8 }
  0xaa   :  { %672 = vmatprep.mubr.bf16.mxu0 %v1702_v9  ;;  %800 = vmatprep.mubr.bf16.mxu1 %v1704_v10 }
  0xb1   :  { %673 = vmatmul.mubr.bf16.gmra.mrb[56].mxu0 %v1706_v11  ;;  %801 = vmatmul.mubr.bf16.gmra.mrb[56].mxu1 %v1707_v12 }
  0xb2   :  { %680 = vmatprep.mubr.bf16.mxu0 %v1708_v13  ;;  %808 = vmatprep.mubr.bf16.mxu1 %v1710_v14 }
  0xb9   :  { %681 = vmatmul.mubr.bf16.gmra.mrb[60].mxu0 %v1712_v15  ;;  %809 = vmatmul.mubr.bf16.gmra.mrb[60].mxu1 %v1713_v16 }
 0x114   :  { %v562_v18 = vpop.f32.mrb[0].mxu0  ;;  %v690_v20 = vpop.f32.mrb[0].mxu1 }
 0x115   :  { %v822_v21 = vmul.f32 %v2037_v17, %v562_v18  ;;  %v854_v22 = vmul.f32 %v2037_v17, %v690_v20  ;;  %v564_v23 = vpop.f32.mrb[1].mxu0  ;;  %v692_v24 = vpop.f32.mrb[1].mxu1 }
 0x116   :  { %v565_v25 = vpop.f32.mrb[2].mxu0  ;;  %v693_v26 = vpop.f32.mrb[2].mxu1 }
 0x117   :  { %v891_v27 = vadd.f32 %v2042_v19, %v822_v21  ;;  %v923_v28 = vadd.f32 %v2042_v19, %v854_v22  ;;  %v823_v29 = vmul.f32 %v2037_v17, %v565_v25  ;;  %v855_v30 = vmul.f32 %v2037_v17, %v693_v26  ;;  %v567_v31 = vpop.f32.mrb[3].mxu0  ;;  %v695_v32 = vpop.f32.mrb[3].mxu1 }
 0x119   :  { %v955_v33 = vmax.f32 %v891_v27, 0.0  ;;  %v987_v34 = vmax.f32 %v923_v28, 0.0  ;;  %v892_v35 = vadd.f32 %v2042_v19, %v823_v29  ;;  %v924_v36 = vadd.f32 %v2042_v19, %v855_v30 }
 0x11b   :  { %v1502_v37 = vpack.c.bf16 %v955_v33, %v955_v33  ;;  %v1534_v38 = vpack.c.bf16 %v987_v34, %v987_v34  ;;  %v956_v39 = vmax.f32 %v892_v35, 0.0  ;;  %v988_v40 = vmax.f32 %v924_v36, 0.0 }
 0x11c   :  { %v570_v41 = vpop.f32.mrb[4].mxu0  ;;  %v698_v42 = vpop.f32.mrb[4].mxu1 }
 0x11d   :  { %1276 = vst.msk [vmem:[#allocation2] sm:$0xf] %vm1275_vm0, %v1502_v37  ;;  %1308 = vst.msk [vmem:[#allocation2 + $0x80] sm:$0xf] %vm1275_vm0, %v1534_v38  ;;  %v1503_v43 = vpack.c.bf16 %v956_v39, %v956_v39  ;;  %v1535_v44 = vpack.c.bf16 %v988_v40, %v988_v40  ;;  %v824_v45 = vmul.f32 %v2037_v17, %v570_v41  ;;  %v572_v47 = vpop.f32.mrb[5].mxu0  ;;  %v700_v48 = vpop.f32.mrb[5].mxu1 }
 0x11e   :  { %v856_v46 = vmul.f32 %v2037_v17, %v698_v42  ;;  %v573_v49 = vpop.f32.mrb[6].mxu0  ;;  %v701_v50 = vpop.f32.mrb[6].mxu1 }
 0x11f   :  { %1277 = vst.msk [vmem:[#allocation2 + $0x4] sm:$0xf] %vm1275_vm0, %v1503_v43  ;;  %1309 = vst.msk [vmem:[#allocation2 + $0x84] sm:$0xf] %vm1275_vm0, %v1535_v44  ;;  %v893_v51 = vadd.f32 %v2042_v19, %v824_v45  ;;  %v825_v53 = vmul.f32 %v2037_v17, %v573_v49  ;;  %v857_v54 = vmul.f32 %v2037_v17, %v701_v50  ;;  %v575_v55 = vpop.f32.mrb[7].mxu0  ;;  %v703_v56 = vpop.f32.mrb[7].mxu1 }
 0x120   :  { %v925_v52 = vadd.f32 %v2042_v19, %v856_v46 }
 0x121   :  { %v957_v57 = vmax.f32 %v893_v51, 0.0  ;;  %v894_v59 = vadd.f32 %v2042_v19, %v825_v53  ;;  %v926_v60 = vadd.f32 %v2042_v19, %v857_v54 }
 0x122   :  { %v989_v58 = vmax.f32 %v925_v52, 0.0 }
 0x123   :  { %v1504_v61 = vpack.c.bf16 %v957_v57, %v957_v57  ;;  %v958_v63 = vmax.f32 %v894_v59, 0.0  ;;  %v990_v0 = vmax.f32 %v926_v60, 0.0 }
 0x124   :  { %v1536_v62 = vpack.c.bf16 %v989_v58, %v989_v58  ;;  %v578_v1 = vpop.f32.mrb[8].mxu0  ;;  %v706_v2 = vpop.f32.mrb[8].mxu1 }
 0x125   :  { %1278 = vst.msk [vmem:[#allocation2 + $0x8] sm:$0xf] %vm1275_vm0, %v1504_v61  ;;  %v1505_v3 = vpack.c.bf16 %v958_v63, %v958_v63  ;;  %v1537_v4 = vpack.c.bf16 %v990_v0, %v990_v0  ;;  %v826_v5 = vmul.f32 %v2037_v17, %v578_v1  ;;  %v858_v6 = vmul.f32 %v2037_v17, %v706_v2  ;;  %v580_v7 = vpop.f32.mrb[9].mxu0  ;;  %v708_v8 = vpop.f32.mrb[9].mxu1 }
 0x126   :  { %1310 = vst.msk [vmem:[#allocation2 + $0x88] sm:$0xf] %vm1275_vm0, %v1536_v62  ;;  %v581_v9 = vpop.f32.mrb[10].mxu0  ;;  %v709_v10 = vpop.f32.mrb[10].mxu1 }
 0x127   :  { %1279 = vst.msk [vmem:[#allocation2 + $0xc] sm:$0xf] %vm1275_vm0, %v1505_v3  ;;  %1311 = vst.msk [vmem:[#allocation2 + $0x8c] sm:$0xf] %vm1275_vm0, %v1537_v4  ;;  %v895_v11 = vadd.f32 %v2042_v19, %v826_v5  ;;  %v927_v12 = vadd.f32 %v2042_v19, %v858_v6  ;;  %v827_v13 = vmul.f32 %v2037_v17, %v581_v9  ;;  %v583_v15 = vpop.f32.mrb[11].mxu0  ;;  %v711_v16 = vpop.f32.mrb[11].mxu1 }
 0x128   :  { %v859_v14 = vmul.f32 %v2037_v17, %v709_v10 }
 0x129   :  { %v959_v18 = vmax.f32 %v895_v11, 0.0  ;;  %v991_v20 = vmax.f32 %v927_v12, 0.0  ;;  %v896_v21 = vadd.f32 %v2042_v19, %v827_v13 }
 0x12a   :  { %v928_v22 = vadd.f32 %v2042_v19, %v859_v14 }
 0x12b   :  { %v1506_v23 = vpack.c.bf16 %v959_v18, %v959_v18  ;;  %v1538_v24 = vpack.c.bf16 %v991_v20, %v991_v20  ;;  %v960_v25 = vmax.f32 %v896_v21, 0.0 }
 0x12c   :  { %v992_v26 = vmax.f32 %v928_v22, 0.0  ;;  %v586_v27 = vpop.f32.mrb[12].mxu0  ;;  %v714_v28 = vpop.f32.mrb[12].mxu1 }
 0x12d   :  { %1280 = vst.msk [vmem:[#allocation2 + $0x10] sm:$0xf] %vm1275_vm0, %v1506_v23  ;;  %1312 = vst.msk [vmem:[#allocation2 + $0x90] sm:$0xf] %vm1275_vm0, %v1538_v24  ;;  %v1507_v29 = vpack.c.bf16 %v960_v25, %v960_v25  ;;  %v828_v31 = vmul.f32 %v2037_v17, %v586_v27  ;;  %v860_v32 = vmul.f32 %v2037_v17, %v714_v28  ;;  %v588_v33 = vpop.f32.mrb[13].mxu0  ;;  %v716_v34 = vpop.f32.mrb[13].mxu1 }
 0x12e   :  { %v1539_v30 = vpack.c.bf16 %v992_v26, %v992_v26  ;;  %v589_v35 = vpop.f32.mrb[14].mxu0  ;;  %v717_v36 = vpop.f32.mrb[14].mxu1 }
 0x12f   :  { %1281 = vst.msk [vmem:[#allocation2 + $0x14] sm:$0xf] %vm1275_vm0, %v1507_v29  ;;  %v897_v37 = vadd.f32 %v2042_v19, %v828_v31  ;;  %v929_v38 = vadd.f32 %v2042_v19, %v860_v32  ;;  %v829_v39 = vmul.f32 %v2037_v17, %v589_v35  ;;  %v861_v40 = vmul.f32 %v2037_v17, %v717_v36  ;;  %v591_v41 = vpop.f32.mrb[15].mxu0  ;;  %v719_v42 = vpop.f32.mrb[15].mxu1 }
 0x130   :  { %1313 = vst.msk [vmem:[#allocation2 + $0x94] sm:$0xf] %vm1275_vm0, %v1539_v30 }
 0x131   :  { %v961_v43 = vmax.f32 %v897_v37, 0.0  ;;  %v993_v44 = vmax.f32 %v929_v38, 0.0  ;;  %v898_v45 = vadd.f32 %v2042_v19, %v829_v39  ;;  %v930_v46 = vadd.f32 %v2042_v19, %v861_v40 }
 0x133   :  { %v1508_v47 = vpack.c.bf16 %v961_v43, %v961_v43  ;;  %v1540_v48 = vpack.c.bf16 %v993_v44, %v993_v44  ;;  %v962_v49 = vmax.f32 %v898_v45, 0.0  ;;  %v994_v50 = vmax.f32 %v930_v46, 0.0 }
 0x134   :  { %v594_v51 = vpop.f32.mrb[16].mxu0  ;;  %v722_v52 = vpop.f32.mrb[16].mxu1 }
 0x135   :  { %1282 = vst.msk [vmem:[#allocation2 + $0x18] sm:$0xf] %vm1275_vm0, %v1508_v47  ;;  %1314 = vst.msk [vmem:[#allocation2 + $0x98] sm:$0xf] %vm1275_vm0, %v1540_v48  ;;  %v1509_v53 = vpack.c.bf16 %v962_v49, %v962_v49  ;;  %v1541_v54 = vpack.c.bf16 %v994_v50, %v994_v50  ;;  %v830_v55 = vmul.f32 %v2037_v17, %v594_v51  ;;  %v596_v57 = vpop.f32.mrb[17].mxu0  ;;  %v724_v58 = vpop.f32.mrb[17].mxu1 }
 0x136   :  { %v862_v56 = vmul.f32 %v2037_v17, %v722_v52  ;;  %v597_v59 = vpop.f32.mrb[18].mxu0  ;;  %v725_v60 = vpop.f32.mrb[18].mxu1 }
 0x137   :  { %1283 = vst.msk [vmem:[#allocation2 + $0x1c] sm:$0xf] %vm1275_vm0, %v1509_v53  ;;  %1315 = vst.msk [vmem:[#allocation2 + $0x9c] sm:$0xf] %vm1275_vm0, %v1541_v54  ;;  %v899_v61 = vadd.f32 %v2042_v19, %v830_v55  ;;  %v831_v63 = vmul.f32 %v2037_v17, %v597_v59  ;;  %v863_v0 = vmul.f32 %v2037_v17, %v725_v60  ;;  %v599_v1 = vpop.f32.mrb[19].mxu0  ;;  %v727_v2 = vpop.f32.mrb[19].mxu1 }
 0x138   :  { %v931_v62 = vadd.f32 %v2042_v19, %v862_v56 }
 0x139   :  { %v963_v3 = vmax.f32 %v899_v61, 0.0  ;;  %v900_v5 = vadd.f32 %v2042_v19, %v831_v63  ;;  %v932_v6 = vadd.f32 %v2042_v19, %v863_v0 }
 0x13a   :  { %v995_v4 = vmax.f32 %v931_v62, 0.0 }
 0x13b   :  { %v1510_v7 = vpack.c.bf16 %v963_v3, %v963_v3  ;;  %v964_v9 = vmax.f32 %v900_v5, 0.0  ;;  %v996_v10 = vmax.f32 %v932_v6, 0.0 }
 0x13c   :  { %v1542_v8 = vpack.c.bf16 %v995_v4, %v995_v4  ;;  %v602_v11 = vpop.f32.mrb[20].mxu0  ;;  %v730_v12 = vpop.f32.mrb[20].mxu1 }
 0x13d   :  { %1284 = vst.msk [vmem:[#allocation2 + $0x20] sm:$0xf] %vm1275_vm0, %v1510_v7  ;;  %v1511_v13 = vpack.c.bf16 %v964_v9, %v964_v9  ;;  %v1543_v14 = vpack.c.bf16 %v996_v10, %v996_v10  ;;  %v832_v15 = vmul.f32 %v2037_v17, %v602_v11  ;;  %v864_v16 = vmul.f32 %v2037_v17, %v730_v12  ;;  %v604_v18 = vpop.f32.mrb[21].mxu0  ;;  %v732_v20 = vpop.f32.mrb[21].mxu1 }
 0x13e   :  { %1316 = vst.msk [vmem:[#allocation2 + $0xa0] sm:$0xf] %vm1275_vm0, %v1542_v8  ;;  %v605_v21 = vpop.f32.mrb[22].mxu0  ;;  %v733_v22 = vpop.f32.mrb[22].mxu1 }
 0x13f   :  { %1285 = vst.msk [vmem:[#allocation2 + $0x24] sm:$0xf] %vm1275_vm0, %v1511_v13  ;;  %1317 = vst.msk [vmem:[#allocation2 + $0xa4] sm:$0xf] %vm1275_vm0, %v1543_v14  ;;  %v901_v23 = vadd.f32 %v2042_v19, %v832_v15  ;;  %v933_v24 = vadd.f32 %v2042_v19, %v864_v16  ;;  %v833_v25 = vmul.f32 %v2037_v17, %v605_v21  ;;  %v607_v27 = vpop.f32.mrb[23].mxu0  ;;  %v735_v28 = vpop.f32.mrb[23].mxu1 }
 0x140   :  { %v865_v26 = vmul.f32 %v2037_v17, %v733_v22 }
 0x141   :  { %v965_v29 = vmax.f32 %v901_v23, 0.0  ;;  %v997_v30 = vmax.f32 %v933_v24, 0.0  ;;  %v902_v31 = vadd.f32 %v2042_v19, %v833_v25 }
 0x142   :  { %v934_v32 = vadd.f32 %v2042_v19, %v865_v26 }
 0x143   :  { %v1512_v33 = vpack.c.bf16 %v965_v29, %v965_v29  ;;  %v1544_v34 = vpack.c.bf16 %v997_v30, %v997_v30  ;;  %v966_v35 = vmax.f32 %v902_v31, 0.0 }
 0x144   :  { %v998_v36 = vmax.f32 %v934_v32, 0.0  ;;  %v610_v37 = vpop.f32.mrb[24].mxu0  ;;  %v738_v38 = vpop.f32.mrb[24].mxu1 }
 0x145   :  { %1286 = vst.msk [vmem:[#allocation2 + $0x28] sm:$0xf] %vm1275_vm0, %v1512_v33  ;;  %1318 = vst.msk [vmem:[#allocation2 + $0xa8] sm:$0xf] %vm1275_vm0, %v1544_v34  ;;  %v1513_v39 = vpack.c.bf16 %v966_v35, %v966_v35  ;;  %v834_v41 = vmul.f32 %v2037_v17, %v610_v37  ;;  %v866_v42 = vmul.f32 %v2037_v17, %v738_v38  ;;  %v612_v43 = vpop.f32.mrb[25].mxu0  ;;  %v740_v44 = vpop.f32.mrb[25].mxu1 }
 0x146   :  { %v1545_v40 = vpack.c.bf16 %v998_v36, %v998_v36  ;;  %v613_v45 = vpop.f32.mrb[26].mxu0  ;;  %v741_v46 = vpop.f32.mrb[26].mxu1 }
 0x147   :  { %1287 = vst.msk [vmem:[#allocation2 + $0x2c] sm:$0xf] %vm1275_vm0, %v1513_v39  ;;  %v903_v47 = vadd.f32 %v2042_v19, %v834_v41  ;;  %v935_v48 = vadd.f32 %v2042_v19, %v866_v42  ;;  %v835_v49 = vmul.f32 %v2037_v17, %v613_v45  ;;  %v867_v50 = vmul.f32 %v2037_v17, %v741_v46  ;;  %v615_v51 = vpop.f32.mrb[27].mxu0  ;;  %v743_v52 = vpop.f32.mrb[27].mxu1 }
 0x148   :  { %1319 = vst.msk [vmem:[#allocation2 + $0xac] sm:$0xf] %vm1275_vm0, %v1545_v40 }
 0x149   :  { %v967_v53 = vmax.f32 %v903_v47, 0.0  ;;  %v999_v54 = vmax.f32 %v935_v48, 0.0  ;;  %v904_v55 = vadd.f32 %v2042_v19, %v835_v49  ;;  %v936_v56 = vadd.f32 %v2042_v19, %v867_v50 }
 0x14b   :  { %v1514_v57 = vpack.c.bf16 %v967_v53, %v967_v53  ;;  %v1546_v58 = vpack.c.bf16 %v999_v54, %v999_v54  ;;  %v968_v59 = vmax.f32 %v904_v55, 0.0  ;;  %v1000_v60 = vmax.f32 %v936_v56, 0.0 }
 0x14c   :  { %v618_v61 = vpop.f32.mrb[28].mxu0  ;;  %v746_v62 = vpop.f32.mrb[28].mxu1 }
 0x14d   :  { %1288 = vst.msk [vmem:[#allocation2 + $0x30] sm:$0xf] %vm1275_vm0, %v1514_v57  ;;  %1320 = vst.msk [vmem:[#allocation2 + $0xb0] sm:$0xf] %vm1275_vm0, %v1546_v58  ;;  %v1515_v63 = vpack.c.bf16 %v968_v59, %v968_v59  ;;  %v1547_v0 = vpack.c.bf16 %v1000_v60, %v1000_v60  ;;  %v836_v1 = vmul.f32 %v2037_v17, %v618_v61  ;;  %v620_v3 = vpop.f32.mrb[29].mxu0  ;;  %v748_v4 = vpop.f32.mrb[29].mxu1 }
 0x14e   :  { %v868_v2 = vmul.f32 %v2037_v17, %v746_v62  ;;  %v621_v5 = vpop.f32.mrb[30].mxu0  ;;  %v749_v6 = vpop.f32.mrb[30].mxu1 }
 0x14f   :  { %1289 = vst.msk [vmem:[#allocation2 + $0x34] sm:$0xf] %vm1275_vm0, %v1515_v63  ;;  %1321 = vst.msk [vmem:[#allocation2 + $0xb4] sm:$0xf] %vm1275_vm0, %v1547_v0  ;;  %v905_v7 = vadd.f32 %v2042_v19, %v836_v1  ;;  %v837_v9 = vmul.f32 %v2037_v17, %v621_v5  ;;  %v869_v10 = vmul.f32 %v2037_v17, %v749_v6  ;;  %v623_v11 = vpop.f32.mrb[31].mxu0  ;;  %v751_v12 = vpop.f32.mrb[31].mxu1 }
 0x150   :  { %v937_v8 = vadd.f32 %v2042_v19, %v868_v2 }
 0x151   :  { %v969_v13 = vmax.f32 %v905_v7, 0.0  ;;  %v906_v15 = vadd.f32 %v2042_v19, %v837_v9  ;;  %v938_v16 = vadd.f32 %v2042_v19, %v869_v10 }
 0x152   :  { %v1001_v14 = vmax.f32 %v937_v8, 0.0 }
 0x153   :  { %v1516_v18 = vpack.c.bf16 %v969_v13, %v969_v13  ;;  %v970_v21 = vmax.f32 %v906_v15, 0.0  ;;  %v1002_v22 = vmax.f32 %v938_v16, 0.0 }
 0x154   :  { %v1548_v20 = vpack.c.bf16 %v1001_v14, %v1001_v14  ;;  %v626_v23 = vpop.f32.mrb[32].mxu0  ;;  %v754_v24 = vpop.f32.mrb[32].mxu1 }
 0x155   :  { %1290 = vst.msk [vmem:[#allocation2 + $0x38] sm:$0xf] %vm1275_vm0, %v1516_v18  ;;  %v1517_v25 = vpack.c.bf16 %v970_v21, %v970_v21  ;;  %v1549_v26 = vpack.c.bf16 %v1002_v22, %v1002_v22  ;;  %v838_v27 = vmul.f32 %v2037_v17, %v626_v23  ;;  %v870_v28 = vmul.f32 %v2037_v17, %v754_v24  ;;  %v628_v29 = vpop.f32.mrb[33].mxu0  ;;  %v756_v30 = vpop.f32.mrb[33].mxu1 }
 0x156   :  { %1322 = vst.msk [vmem:[#allocation2 + $0xb8] sm:$0xf] %vm1275_vm0, %v1548_v20  ;;  %v629_v31 = vpop.f32.mrb[34].mxu0  ;;  %v757_v32 = vpop.f32.mrb[34].mxu1 }
 0x157   :  { %1291 = vst.msk [vmem:[#allocation2 + $0x3c] sm:$0xf] %vm1275_vm0, %v1517_v25  ;;  %1323 = vst.msk [vmem:[#allocation2 + $0xbc] sm:$0xf] %vm1275_vm0, %v1549_v26  ;;  %v907_v33 = vadd.f32 %v2042_v19, %v838_v27  ;;  %v939_v34 = vadd.f32 %v2042_v19, %v870_v28  ;;  %v839_v35 = vmul.f32 %v2037_v17, %v629_v31  ;;  %v631_v37 = vpop.f32.mrb[35].mxu0  ;;  %v759_v38 = vpop.f32.mrb[35].mxu1 }
 0x158   :  { %v871_v36 = vmul.f32 %v2037_v17, %v757_v32 }
 0x159   :  { %v971_v39 = vmax.f32 %v907_v33, 0.0  ;;  %v1003_v40 = vmax.f32 %v939_v34, 0.0  ;;  %v908_v41 = vadd.f32 %v2042_v19, %v839_v35 }
 0x15a   :  { %v940_v42 = vadd.f32 %v2042_v19, %v871_v36 }
 0x15b   :  { %v1518_v43 = vpack.c.bf16 %v971_v39, %v971_v39  ;;  %v1550_v44 = vpack.c.bf16 %v1003_v40, %v1003_v40  ;;  %v972_v45 = vmax.f32 %v908_v41, 0.0 }
 0x15c   :  { %v1004_v46 = vmax.f32 %v940_v42, 0.0  ;;  %v634_v47 = vpop.f32.mrb[36].mxu0  ;;  %v762_v48 = vpop.f32.mrb[36].mxu1 }
 0x15d   :  { %1292 = vst.msk [vmem:[#allocation2 + $0x40] sm:$0xf] %vm1275_vm0, %v1518_v43  ;;  %1324 = vst.msk [vmem:[#allocation2 + $0xc0] sm:$0xf] %vm1275_vm0, %v1550_v44  ;;  %v1519_v49 = vpack.c.bf16 %v972_v45, %v972_v45  ;;  %v840_v51 = vmul.f32 %v2037_v17, %v634_v47  ;;  %v872_v52 = vmul.f32 %v2037_v17, %v762_v48  ;;  %v636_v53 = vpop.f32.mrb[37].mxu0  ;;  %v764_v54 = vpop.f32.mrb[37].mxu1 }
 0x15e   :  { %v1551_v50 = vpack.c.bf16 %v1004_v46, %v1004_v46  ;;  %v637_v55 = vpop.f32.mrb[38].mxu0  ;;  %v765_v56 = vpop.f32.mrb[38].mxu1 }
 0x15f   :  { %1293 = vst.msk [vmem:[#allocation2 + $0x44] sm:$0xf] %vm1275_vm0, %v1519_v49  ;;  %v909_v57 = vadd.f32 %v2042_v19, %v840_v51  ;;  %v941_v58 = vadd.f32 %v2042_v19, %v872_v52  ;;  %v841_v59 = vmul.f32 %v2037_v17, %v637_v55  ;;  %v873_v60 = vmul.f32 %v2037_v17, %v765_v56  ;;  %v639_v61 = vpop.f32.mrb[39].mxu0  ;;  %v767_v62 = vpop.f32.mrb[39].mxu1 }
 0x160   :  { %1325 = vst.msk [vmem:[#allocation2 + $0xc4] sm:$0xf] %vm1275_vm0, %v1551_v50 }
 0x161   :  { %v973_v63 = vmax.f32 %v909_v57, 0.0  ;;  %v1005_v0 = vmax.f32 %v941_v58, 0.0  ;;  %v910_v1 = vadd.f32 %v2042_v19, %v841_v59  ;;  %v942_v2 = vadd.f32 %v2042_v19, %v873_v60 }
 0x163   :  { %v1520_v3 = vpack.c.bf16 %v973_v63, %v973_v63  ;;  %v1552_v4 = vpack.c.bf16 %v1005_v0, %v1005_v0  ;;  %v974_v5 = vmax.f32 %v910_v1, 0.0  ;;  %v1006_v6 = vmax.f32 %v942_v2, 0.0 }
 0x164   :  { %v642_v7 = vpop.f32.mrb[40].mxu0  ;;  %v770_v8 = vpop.f32.mrb[40].mxu1 }
 0x165   :  { %1294 = vst.msk [vmem:[#allocation2 + $0x48] sm:$0xf] %vm1275_vm0, %v1520_v3  ;;  %1326 = vst.msk [vmem:[#allocation2 + $0xc8] sm:$0xf] %vm1275_vm0, %v1552_v4  ;;  %v1521_v9 = vpack.c.bf16 %v974_v5, %v974_v5  ;;  %v1553_v10 = vpack.c.bf16 %v1006_v6, %v1006_v6  ;;  %v842_v11 = vmul.f32 %v2037_v17, %v642_v7  ;;  %v644_v13 = vpop.f32.mrb[41].mxu0  ;;  %v772_v14 = vpop.f32.mrb[41].mxu1 }
 0x166   :  { %v874_v12 = vmul.f32 %v2037_v17, %v770_v8  ;;  %v645_v15 = vpop.f32.mrb[42].mxu0  ;;  %v773_v16 = vpop.f32.mrb[42].mxu1 }
 0x167   :  { %1295 = vst.msk [vmem:[#allocation2 + $0x4c] sm:$0xf] %vm1275_vm0, %v1521_v9  ;;  %1327 = vst.msk [vmem:[#allocation2 + $0xcc] sm:$0xf] %vm1275_vm0, %v1553_v10  ;;  %v911_v18 = vadd.f32 %v2042_v19, %v842_v11  ;;  %v843_v21 = vmul.f32 %v2037_v17, %v645_v15  ;;  %v875_v22 = vmul.f32 %v2037_v17, %v773_v16  ;;  %v647_v23 = vpop.f32.mrb[43].mxu0  ;;  %v775_v24 = vpop.f32.mrb[43].mxu1 }
 0x168   :  { %v943_v20 = vadd.f32 %v2042_v19, %v874_v12 }
 0x169   :  { %v975_v25 = vmax.f32 %v911_v18, 0.0  ;;  %v912_v27 = vadd.f32 %v2042_v19, %v843_v21  ;;  %v944_v28 = vadd.f32 %v2042_v19, %v875_v22 }
 0x16a   :  { %v1007_v26 = vmax.f32 %v943_v20, 0.0 }
 0x16b   :  { %v1522_v29 = vpack.c.bf16 %v975_v25, %v975_v25  ;;  %v976_v31 = vmax.f32 %v912_v27, 0.0  ;;  %v1008_v32 = vmax.f32 %v944_v28, 0.0 }
 0x16c   :  { %v1554_v30 = vpack.c.bf16 %v1007_v26, %v1007_v26  ;;  %v650_v33 = vpop.f32.mrb[44].mxu0  ;;  %v778_v34 = vpop.f32.mrb[44].mxu1 }
 0x16d   :  { %1296 = vst.msk [vmem:[#allocation2 + $0x50] sm:$0xf] %vm1275_vm0, %v1522_v29  ;;  %v1523_v35 = vpack.c.bf16 %v976_v31, %v976_v31  ;;  %v1555_v36 = vpack.c.bf16 %v1008_v32, %v1008_v32  ;;  %v844_v37 = vmul.f32 %v2037_v17, %v650_v33  ;;  %v876_v38 = vmul.f32 %v2037_v17, %v778_v34  ;;  %v652_v39 = vpop.f32.mrb[45].mxu0  ;;  %v780_v40 = vpop.f32.mrb[45].mxu1 }
 0x16e   :  { %1328 = vst.msk [vmem:[#allocation2 + $0xd0] sm:$0xf] %vm1275_vm0, %v1554_v30  ;;  %v653_v41 = vpop.f32.mrb[46].mxu0  ;;  %v781_v42 = vpop.f32.mrb[46].mxu1 }
 0x16f   :  { %1297 = vst.msk [vmem:[#allocation2 + $0x54] sm:$0xf] %vm1275_vm0, %v1523_v35  ;;  %1329 = vst.msk [vmem:[#allocation2 + $0xd4] sm:$0xf] %vm1275_vm0, %v1555_v36  ;;  %v913_v43 = vadd.f32 %v2042_v19, %v844_v37  ;;  %v945_v44 = vadd.f32 %v2042_v19, %v876_v38  ;;  %v845_v45 = vmul.f32 %v2037_v17, %v653_v41  ;;  %v655_v47 = vpop.f32.mrb[47].mxu0  ;;  %v783_v48 = vpop.f32.mrb[47].mxu1 }
 0x170   :  { %v877_v46 = vmul.f32 %v2037_v17, %v781_v42 }
 0x171   :  { %v977_v49 = vmax.f32 %v913_v43, 0.0  ;;  %v1009_v50 = vmax.f32 %v945_v44, 0.0  ;;  %v914_v51 = vadd.f32 %v2042_v19, %v845_v45 }
 0x172   :  { %v946_v52 = vadd.f32 %v2042_v19, %v877_v46 }
 0x173   :  { %v1524_v53 = vpack.c.bf16 %v977_v49, %v977_v49  ;;  %v1556_v54 = vpack.c.bf16 %v1009_v50, %v1009_v50  ;;  %v978_v55 = vmax.f32 %v914_v51, 0.0 }
 0x174   :  { %v1010_v56 = vmax.f32 %v946_v52, 0.0  ;;  %v658_v57 = vpop.f32.mrb[48].mxu0  ;;  %v786_v58 = vpop.f32.mrb[48].mxu1 }
 0x175   :  { %1298 = vst.msk [vmem:[#allocation2 + $0x58] sm:$0xf] %vm1275_vm0, %v1524_v53  ;;  %1330 = vst.msk [vmem:[#allocation2 + $0xd8] sm:$0xf] %vm1275_vm0, %v1556_v54  ;;  %v1525_v59 = vpack.c.bf16 %v978_v55, %v978_v55  ;;  %v846_v61 = vmul.f32 %v2037_v17, %v658_v57  ;;  %v878_v62 = vmul.f32 %v2037_v17, %v786_v58  ;;  %v660_v63 = vpop.f32.mrb[49].mxu0  ;;  %v788_v0 = vpop.f32.mrb[49].mxu1 }
 0x176   :  { %v1557_v60 = vpack.c.bf16 %v1010_v56, %v1010_v56  ;;  %v661_v1 = vpop.f32.mrb[50].mxu0  ;;  %v789_v2 = vpop.f32.mrb[50].mxu1 }
 0x177   :  { %1299 = vst.msk [vmem:[#allocation2 + $0x5c] sm:$0xf] %vm1275_vm0, %v1525_v59  ;;  %v915_v3 = vadd.f32 %v2042_v19, %v846_v61  ;;  %v947_v4 = vadd.f32 %v2042_v19, %v878_v62  ;;  %v847_v5 = vmul.f32 %v2037_v17, %v661_v1  ;;  %v879_v6 = vmul.f32 %v2037_v17, %v789_v2  ;;  %v663_v7 = vpop.f32.mrb[51].mxu0  ;;  %v791_v8 = vpop.f32.mrb[51].mxu1 }
 0x178   :  { %1331 = vst.msk [vmem:[#allocation2 + $0xdc] sm:$0xf] %vm1275_vm0, %v1557_v60 }
 0x179   :  { %v979_v9 = vmax.f32 %v915_v3, 0.0  ;;  %v1011_v10 = vmax.f32 %v947_v4, 0.0  ;;  %v916_v11 = vadd.f32 %v2042_v19, %v847_v5  ;;  %v948_v12 = vadd.f32 %v2042_v19, %v879_v6 }
 0x17b   :  { %v1526_v13 = vpack.c.bf16 %v979_v9, %v979_v9  ;;  %v1558_v14 = vpack.c.bf16 %v1011_v10, %v1011_v10  ;;  %v980_v15 = vmax.f32 %v916_v11, 0.0  ;;  %v1012_v16 = vmax.f32 %v948_v12, 0.0 }
 0x17c   :  { %v666_v18 = vpop.f32.mrb[52].mxu0  ;;  %v794_v20 = vpop.f32.mrb[52].mxu1 }
 0x17d   :  { %1300 = vst.msk [vmem:[#allocation2 + $0x60] sm:$0xf] %vm1275_vm0, %v1526_v13  ;;  %1332 = vst.msk [vmem:[#allocation2 + $0xe0] sm:$0xf] %vm1275_vm0, %v1558_v14  ;;  %v1527_v21 = vpack.c.bf16 %v980_v15, %v980_v15  ;;  %v1559_v22 = vpack.c.bf16 %v1012_v16, %v1012_v16  ;;  %v848_v23 = vmul.f32 %v2037_v17, %v666_v18  ;;  %v668_v25 = vpop.f32.mrb[53].mxu0  ;;  %v796_v26 = vpop.f32.mrb[53].mxu1 }
 0x17e   :  { %v880_v24 = vmul.f32 %v2037_v17, %v794_v20  ;;  %v669_v27 = vpop.f32.mrb[54].mxu0  ;;  %v797_v28 = vpop.f32.mrb[54].mxu1 }
 0x17f   :  { %1301 = vst.msk [vmem:[#allocation2 + $0x64] sm:$0xf] %vm1275_vm0, %v1527_v21  ;;  %1333 = vst.msk [vmem:[#allocation2 + $0xe4] sm:$0xf] %vm1275_vm0, %v1559_v22  ;;  %v917_v29 = vadd.f32 %v2042_v19, %v848_v23  ;;  %v849_v31 = vmul.f32 %v2037_v17, %v669_v27  ;;  %v881_v32 = vmul.f32 %v2037_v17, %v797_v28  ;;  %v671_v33 = vpop.f32.mrb[55].mxu0  ;;  %v799_v34 = vpop.f32.mrb[55].mxu1 }
 0x180   :  { %v949_v30 = vadd.f32 %v2042_v19, %v880_v24 }
 0x181   :  { %v981_v35 = vmax.f32 %v917_v29, 0.0  ;;  %v918_v37 = vadd.f32 %v2042_v19, %v849_v31  ;;  %v950_v38 = vadd.f32 %v2042_v19, %v881_v32 }
 0x182   :  { %v1013_v36 = vmax.f32 %v949_v30, 0.0 }
 0x183   :  { %v1528_v39 = vpack.c.bf16 %v981_v35, %v981_v35  ;;  %v982_v41 = vmax.f32 %v918_v37, 0.0  ;;  %v1014_v42 = vmax.f32 %v950_v38, 0.0 }
 0x184   :  { %v1560_v40 = vpack.c.bf16 %v1013_v36, %v1013_v36  ;;  %v674_v43 = vpop.f32.mrb[56].mxu0  ;;  %v802_v44 = vpop.f32.mrb[56].mxu1 }
 0x185   :  { %1302 = vst.msk [vmem:[#allocation2 + $0x68] sm:$0xf] %vm1275_vm0, %v1528_v39  ;;  %v1529_v45 = vpack.c.bf16 %v982_v41, %v982_v41  ;;  %v1561_v46 = vpack.c.bf16 %v1014_v42, %v1014_v42  ;;  %v850_v47 = vmul.f32 %v2037_v17, %v674_v43  ;;  %v882_v48 = vmul.f32 %v2037_v17, %v802_v44  ;;  %v676_v49 = vpop.f32.mrb[57].mxu0  ;;  %v804_v50 = vpop.f32.mrb[57].mxu1 }
 0x186   :  { %1334 = vst.msk [vmem:[#allocation2 + $0xe8] sm:$0xf] %vm1275_vm0, %v1560_v40  ;;  %v677_v51 = vpop.f32.mrb[58].mxu0  ;;  %v805_v52 = vpop.f32.mrb[58].mxu1 }
 0x187   :  { %1303 = vst.msk [vmem:[#allocation2 + $0x6c] sm:$0xf] %vm1275_vm0, %v1529_v45  ;;  %1335 = vst.msk [vmem:[#allocation2 + $0xec] sm:$0xf] %vm1275_vm0, %v1561_v46  ;;  %v919_v53 = vadd.f32 %v2042_v19, %v850_v47  ;;  %v951_v54 = vadd.f32 %v2042_v19, %v882_v48  ;;  %v851_v55 = vmul.f32 %v2037_v17, %v677_v51  ;;  %v679_v57 = vpop.f32.mrb[59].mxu0  ;;  %v807_v58 = vpop.f32.mrb[59].mxu1 }
 0x188   :  { %v883_v56 = vmul.f32 %v2037_v17, %v805_v52 }
 0x189   :  { %v983_v59 = vmax.f32 %v919_v53, 0.0  ;;  %v1015_v60 = vmax.f32 %v951_v54, 0.0  ;;  %v920_v61 = vadd.f32 %v2042_v19, %v851_v55 }
 0x18a   :  { %v952_v62 = vadd.f32 %v2042_v19, %v883_v56 }
 0x18b   :  { %v1530_v63 = vpack.c.bf16 %v983_v59, %v983_v59  ;;  %v1562_v0 = vpack.c.bf16 %v1015_v60, %v1015_v60  ;;  %v984_v1 = vmax.f32 %v920_v61, 0.0 }
 0x18c   :  { %v1016_v2 = vmax.f32 %v952_v62, 0.0  ;;  %v682_v3 = vpop.f32.mrb[60].mxu0  ;;  %v810_v4 = vpop.f32.mrb[60].mxu1 }
 0x18d   :  { %1304 = vst.msk [vmem:[#allocation2 + $0x70] sm:$0xf] %vm1275_vm0, %v1530_v63  ;;  %1336 = vst.msk [vmem:[#allocation2 + $0xf0] sm:$0xf] %vm1275_vm0, %v1562_v0  ;;  %v1531_v5 = vpack.c.bf16 %v984_v1, %v984_v1  ;;  %v852_v7 = vmul.f32 %v2037_v17, %v682_v3  ;;  %v884_v8 = vmul.f32 %v2037_v17, %v810_v4  ;;  %v684_v9 = vpop.f32.mrb[61].mxu0  ;;  %v812_v10 = vpop.f32.mrb[61].mxu1 }
 0x18e   :  { %v1563_v6 = vpack.c.bf16 %v1016_v2, %v1016_v2  ;;  %v685_v11 = vpop.f32.mrb[62].mxu0  ;;  %v813_v12 = vpop.f32.mrb[62].mxu1 }
 0x18f   :  { %1305 = vst.msk [vmem:[#allocation2 + $0x74] sm:$0xf] %vm1275_vm0, %v1531_v5  ;;  %v921_v13 = vadd.f32 %v2042_v19, %v852_v7  ;;  %v953_v14 = vadd.f32 %v2042_v19, %v884_v8  ;;  %v853_v15 = vmul.f32 %v2037_v17, %v685_v11  ;;  %v885_v16 = vmul.f32 %v2037_v17, %v813_v12  ;;  %v687_v18 = vpop.f32.mrb[63].mxu0  ;;  %v815_v20 = vpop.f32.mrb[63].mxu1 }
 0x190   :  { %1337 = vst.msk [vmem:[#allocation2 + $0xf4] sm:$0xf] %vm1275_vm0, %v1563_v6 }
 0x191   :  { %v985_v21 = vmax.f32 %v921_v13, 0.0  ;;  %v1017_v22 = vmax.f32 %v953_v14, 0.0  ;;  %v922_v23 = vadd.f32 %v2042_v19, %v853_v15  ;;  %v954_v24 = vadd.f32 %v2042_v19, %v885_v16 }
 0x193   :  { %v1532_v25 = vpack.c.bf16 %v985_v21, %v985_v21  ;;  %v1564_v26 = vpack.c.bf16 %v1017_v22, %v1017_v22  ;;  %v986_v27 = vmax.f32 %v922_v23, 0.0  ;;  %v1018_v28 = vmax.f32 %v954_v24, 0.0 }
 0x195   :  { %1306 = vst.msk [vmem:[#allocation2 + $0x78] sm:$0xf] %vm1275_vm0, %v1532_v25  ;;  %1338 = vst.msk [vmem:[#allocation2 + $0xf8] sm:$0xf] %vm1275_vm0, %v1564_v26  ;;  %v1533_v17 = vpack.c.bf16 %v986_v27, %v986_v27  ;;  %v1565_v29 = vpack.c.bf16 %v1018_v28, %v1018_v28 }
 0x197   :  { %1307 = vst.msk [vmem:[#allocation2 + $0x7c] sm:$0xf] %vm1275_vm0, %v1533_v17  ;;  %1339 = vst.msk [vmem:[#allocation2 + $0xfc] sm:$0xf] %vm1275_vm0, %v1565_v29 }
 0x198   :  { %1725 = shalt.err (!%p1722_p4)
}
 0x199   :  { %s1726_s12 = scalar_lea.hbm %s2251_s3, 4096 }
 0x19a   :  { %p1727_p5 = scmp.ne.s32.totalorder %s2251_s3, %s1726_s12  ;;  %p1730_p6 = scmp.lt.u32.totalorder %s1726_s12, %s2251_s3 }
 0x19c   :  { %p1732_p7 = pnand %p1730_p6, %p1727_p5 }
 0x19e   :  { %1735 = shalt.err (!%p1732_p7)
}
 0x19f   :  { %s1740_s17 = smov 64   ;;  %s1741_s18 = smov 4  }
 0x1a0   :  { %1351 = dma.vmem_to_hbm [thread:$0]  %s1346_s2, 4096, %s2251_s3, [#allocation3], %s1740_s17, %s1740_s17, %s1741_s18  }
 0x1a1   :  { %1736 = dma.done.wait [#allocation3], 4096  }
 0x1a2   :  { %1737 = vsyncadd [#allocation3], 4294963200 }
 0x1a3   :  { %1355 = vsyncpa [#allocation3], 1 }

</bundles_post_ra>
